<compile_context>
chip_gen: v6e
topology: v6e:2x2x1
jax: 0.10.0
libtpu: 0.0.40
codegen_flags: <defaults>
</compile_context>

<pallas_src>
import jax
import jax.numpy as jnp
from jax.experimental import pallas as pl
from jax.experimental.pallas import tpu as pltpu


def author_lstm_kernel(gx_ref,      # (T, BB, 4H)  fwd gate pre-acts: emb @ W_ih_f + b_f
                       gb_ref,      # (BB, 4H)     bwd gate pre-acts for x[T-1]
                       whh_ref,     # (4H, 4H)     fwd W_hh, rows [H:) zero (wide-h trick)
                       wlin_f_ref,  # (4H, Cp)     rows [H:) zero, cols [C:) zero
                       wlin_b_ref,  # (4H, Cp)     rows [H:) zero, cols [C:) zero
                       blin_ref,    # (1,  Cp)     cols [C:) = -1e30 (softmax pad)
                       out_ref):    # (BB, Cp)
    T, B, G = gx_ref.shape
    H = G // 4

    # Lane mask selecting the g-gate segment (tanh); hoisted once, reused every step.
    lane = jax.lax.broadcasted_iota(jnp.int32, (B, G), 1)
    g_mask = (lane >= 2 * H) & (lane < 3 * H)

    def cell(gates, c):
        """gates: (B,4H) pre-activations in PyTorch order [i|f|g|o];
        c: (B,4H) with the real cell state in lanes [0,H).  Returns (h, c)."""
        # Single EUP transcendental for all four gates:
        #   sigmoid(x) = 0.5*(1 + tanh(x/2));  g lanes use tanh(x) directly.
        xs = jnp.where(g_mask, gates, 0.5 * gates)       # VPU
        th = jnp.tanh(xs)                                # EUP (full vreg)
        act = jnp.where(g_mask, th, 0.5 * th + 0.5)      # VPU
        f_al = pltpu.roll(act, 3 * H, 1)   # f segment -> lanes [0,H)   (XLU)
        g_al = pltpu.roll(act, 2 * H, 1)   # g segment -> lanes [0,H)   (XLU)
        o_al = pltpu.roll(act, 1 * H, 1)   # o segment -> lanes [0,H)   (XLU)
        c_new = f_al * c + act * g_al      # i already lives in lanes [0,H)
        h_new = o_al * jnp.tanh(c_new)     # valid in lanes [0,H); rest bounded junk
        return h_new, c_new

    zeros_state = jnp.zeros((B, G), jnp.float32)

    # Reverse direction: out[-1][:, H:] is the reverse LSTM after exactly ONE step
    # on x[T-1] from zero state (h0 = 0 => no h @ W_hh term).  Independent of the
    # forward recurrence, so it is issued first and hides under the first steps.
    h_bwd, _ = cell(gb_ref[...], zeros_state)
    part_bwd = (jnp.dot(h_bwd, wlin_b_ref[...], preferred_element_type=jnp.float32)
                + blin_ref[...])

    # Forward direction: per step, a single (B,4H)x(4H,4H) MXU matmul + the cell.
    w_hh = whh_ref[...]
    h, c = cell(gx_ref[0], zeros_state)       # h0 == 0 -> skip the first h @ W_hh
    # TODO(synk): for large T / batch blocks, switch to lax.fori_loop(unroll=True)
    # with gates staged in a VMEM scratch to bound live ranges (v7x: 64 MiB VMEM).
    for step in range(1, T):                  # static unroll: T is small & fixed
        gates = gx_ref[step] + jnp.dot(h, w_hh, preferred_element_type=jnp.float32)
        h, c = cell(gates, c)

    # Classifier + softmax over the padded, lane-dense class dim; padded columns
    # carry a -1e30 bias so exp -> 0 and the row sums are exact over real classes.
    logits = part_bwd + jnp.dot(h, wlin_f_ref[...], preferred_element_type=jnp.float32)
    m = jnp.max(logits, axis=1, keepdims=True)
    e = jnp.exp(logits - m)
    denom = jnp.sum(e, axis=1, keepdims=True)
    out_ref[...] = e / denom                   # exact divide: rows sum to 1


def prepare_params(params, *, class_pad=128):
    """One-time parameter preparation (hoisted out of the per-forward path)."""
    H = params["whh_f"].shape[0]
    G = 4 * H
    C = params["blin"].shape[1]
    Cp = max(class_pad, C)
    emb = params["embedding"].astype(jnp.float32)
    # Fold the embedding lookup and the input projections (plus biases) into tables.
    gproj_f = emb @ params["wih_f"] + params["b_f"]     # (vocab, 4H)
    gproj_b = emb @ params["wih_b"] + params["b_b"]     # (vocab, 4H)
    # Widen recurrent / classifier weights to 4H rows (rows [H:) zero) so the kernel
    # carries h 4H lanes wide and never slices sub-tile lanes; pad the class dim to
    # a full 128-lane tile (zero weight columns, -1e30 bias -> exp underflows to 0).
    whh_w = jnp.zeros((G, G), jnp.float32).at[:H].set(params["whh_f"])
    wlin_f_w = jnp.zeros((G, Cp), jnp.float32).at[:H, :C].set(params["wlin_f"])
    wlin_b_w = jnp.zeros((G, Cp), jnp.float32).at[:H, :C].set(params["wlin_b"])
    blin_w = jnp.full((1, Cp), -1e30, jnp.float32).at[:, :C].set(params["blin"])
    return {"gproj_f": gproj_f, "gproj_b": gproj_b, "whh": whh_w,
            "wlin_f": wlin_f_w, "wlin_b": wlin_b_w, "blin": blin_w}


def author_lstm_forward(prepared, token_ids, *, n_classes, block_b=8):
    """token_ids: (batch, seq) int32 -> class probabilities (batch, n_classes)."""
    assert block_b % 8 == 0, "batch block must be a multiple of the 8-row sublane tile"
    B, T = token_ids.shape
    G = prepared["whh"].shape[0]
    Cp = prepared["blin"].shape[1]

    # Gather gate pre-activations directly from the projected tables (lane-dense).
    # TODO(synk): for long sequences fuse this gather into the kernel with
    # PrefetchScalarGridSpec (token ids in SMEM, per-row DMA gather from HBM).
    ids_t = token_ids.T                                       # time-major (T, B)
    gx = jnp.take(prepared["gproj_f"], ids_t, axis=0)         # (T, B, 4H)
    gb = jnp.take(prepared["gproj_b"], ids_t[T - 1], axis=0)  # (B, 4H)

    # Pad batch to a multiple of the batch block; padded rows are sliced off after.
    Bp = max(block_b, pl.cdiv(B, block_b) * block_b)
    if Bp != B:
        gx = jnp.pad(gx, ((0, 0), (0, Bp - B), (0, 0)))
        gb = jnp.pad(gb, ((0, Bp - B), (0, 0)))

    out = pl.pallas_call(
        author_lstm_kernel,
        out_shape=jax.ShapeDtypeStruct((Bp, Cp), jnp.float32),
        grid=(Bp // block_b,),
        in_specs=[
            pl.BlockSpec((T, block_b, G), lambda b: (0, b, 0)),   # per-block gates
            pl.BlockSpec((block_b, G), lambda b: (b, 0)),
            pl.BlockSpec((G, G), lambda b: (0, 0)),               # weights resident
            pl.BlockSpec((G, Cp), lambda b: (0, 0)),
            pl.BlockSpec((G, Cp), lambda b: (0, 0)),
            pl.BlockSpec((1, Cp), lambda b: (0, 0)),
        ],
        out_specs=pl.BlockSpec((block_b, Cp), lambda b: (b, 0)),
        compiler_params=pltpu.CompilerParams(
            dimension_semantics=("parallel",)),    # batch blocks -> both v7x cores
    )(gx, gb, prepared["whh"], prepared["wlin_f"], prepared["wlin_b"], prepared["blin"])
    return out[:B, :n_classes]


def reference_forward(params, token_ids):
    """Pure-JAX reference mirroring the PyTorch forward semantics."""
    embeds = jnp.take(params["embedding"], token_ids.T, axis=0).astype(jnp.float32)
    T, B, _E = embeds.shape
    H = params["whh_f"].shape[0]

    def cell(x, h, c, wih, whh, b):
        g = x @ wih + h @ whh + b
        i = jax.nn.sigmoid(g[:, :H])
        f = jax.nn.sigmoid(g[:, H:2 * H])
        gg = jnp.tanh(g[:, 2 * H:3 * H])
        o = jax.nn.sigmoid(g[:, 3 * H:])
        c = f * c + i * gg
        return o * jnp.tanh(c), c

    h = jnp.zeros((B, H), jnp.float32)
    c = jnp.zeros((B, H), jnp.float32)
    for t in range(T):
        h, c = cell(embeds[t], h, c, params["wih_f"], params["whh_f"], params["b_f"])
    hb, _ = cell(embeds[T - 1], jnp.zeros((B, H)), jnp.zeros((B, H)),
                 params["wih_b"], params["whh_b"], params["b_b"])
    logits = h @ params["wlin_f"] + hb @ params["wlin_b"] + params["blin"]
    return jax.nn.softmax(logits, axis=1)


if __name__ == "__main__":
    # Small shapes consistent with AuthorLSTM(vocab, embed, hidden, classes, bi=True).
    vocab_size, embed_dim, hidden, n_classes = 32, 16, 32, 2
    batch, seq = 2, 8

    key = jax.random.PRNGKey(0)
    keys = jax.random.split(key, 13)
    k_lstm = float(1.0 / (hidden ** 0.5))
    k_lin = float(1.0 / ((2 * hidden) ** 0.5))

    def u(k, shape, bound):
        return jax.random.uniform(k, shape, jnp.float32, -bound, bound)

    # Deterministic synthetic parameters (PyTorch-style inits), pre-transposed to
    # (in_features, out_features); LSTM biases b_ih + b_hh folded together.
    # NOTE: nn.LSTM(dropout=True) has no effect with n_layers=1 (inter-layer only).
    params = {
        "embedding": jax.random.normal(keys[0], (vocab_size, embed_dim), jnp.float32),
        "wih_f": u(keys[1], (embed_dim, 4 * hidden), k_lstm),
        "whh_f": u(keys[2], (hidden, 4 * hidden), k_lstm),
        "b_f": u(keys[3], (1, 4 * hidden), k_lstm) + u(keys[4], (1, 4 * hidden), k_lstm),
        "wih_b": u(keys[5], (embed_dim, 4 * hidden), k_lstm),
        "whh_b": u(keys[6], (hidden, 4 * hidden), k_lstm),
        "b_b": u(keys[7], (1, 4 * hidden), k_lstm) + u(keys[8], (1, 4 * hidden), k_lstm),
        "wlin_f": u(keys[9], (hidden, n_classes), k_lin),
        "wlin_b": u(keys[10], (hidden, n_classes), k_lin),
        "blin": u(keys[11], (1, n_classes), k_lin),
    }

    token_ids = jax.random.randint(keys[12], (batch, seq), 0, vocab_size, jnp.int32)

    prepared = prepare_params(params)               # once, off the per-call path
    fwd = jax.jit(author_lstm_forward, static_argnames=("n_classes", "block_b"))
    out = fwd(prepared, token_ids, n_classes=n_classes)
    out = jax.block_until_ready(out)

    ref = reference_forward(params, token_ids)
    assert out.shape == (batch, n_classes)
    assert jnp.allclose(jnp.sum(out, axis=1), 1.0, atol=1e-3)   # exact divide now
    assert jnp.allclose(out, ref, rtol=1e-3, atol=1e-3)
    print("KERNEL_OK")
</pallas_src>

<mosaic_0001>
module attributes {stable_mosaic.version = 11 : i64} {
  func.func @author_lstm_kernel(%arg0: i32, %arg1: memref<8x8x128xf32, #tpu.memory_space<vmem>>, %arg2: memref<8x128xf32, #tpu.memory_space<vmem>>, %arg3: memref<128x128xf32, #tpu.memory_space<vmem>>, %arg4: memref<128x128xf32, #tpu.memory_space<vmem>>, %arg5: memref<128x128xf32, #tpu.memory_space<vmem>>, %arg6: memref<1x128xf32, #tpu.memory_space<vmem>>, %arg7: memref<8x128xf32, #tpu.memory_space<vmem>>) attributes {dimension_semantics = [#tpu.dimension_semantics<parallel>], iteration_bounds = array<i64: 1>, scalar_prefetch = 0 : i64, scratch_operands = 0 : i64, tpu.core_type = #tpu.core_type<tc>, window_params = [{transform_indices = @transform_0, window_bounds = array<i64: 8, 8, 128>}, {transform_indices = @transform_1, window_bounds = array<i64: 8, 128>}, {pipeline_mode = #tpu.pipeline_mode<synchronous>, transform_indices = @transform_2, window_bounds = array<i64: 128, 128>}, {pipeline_mode = #tpu.pipeline_mode<synchronous>, transform_indices = @transform_3, window_bounds = array<i64: 128, 128>}, {pipeline_mode = #tpu.pipeline_mode<synchronous>, transform_indices = @transform_4, window_bounds = array<i64: 128, 128>}, {pipeline_mode = #tpu.pipeline_mode<synchronous>, transform_indices = @transform_5, window_bounds = array<i64: 1, 128>}, {transform_indices = @transform_6, window_bounds = array<i64: 8, 128>}]} {
    %0 = tpu.iota {dimensions = array<i32: 1>} : vector<8x128xi32>
    %c64_i32 = arith.constant 64 : i32
    %1 = vector.broadcast %c64_i32 : i32 to vector<8x128xi32>
    %2 = arith.cmpi sge, %0, %1 : vector<8x128xi32>
    %c96_i32 = arith.constant 96 : i32
    %3 = vector.broadcast %c96_i32 : i32 to vector<8x128xi32>
    %4 = arith.cmpi slt, %0, %3 : vector<8x128xi32>
    %5 = arith.andi %2, %4 : vector<8x128xi1>
    %cst = arith.constant 0.000000e+00 : f32
    %6 = vector.broadcast %cst : f32 to vector<8x128xf32>
    %c0 = arith.constant 0 : index
    %c0_0 = arith.constant 0 : index
    %7 = vector.load %arg2[%c0, %c0_0] : memref<8x128xf32, #tpu.memory_space<vmem>>, vector<8x128xf32>
    %cst_1 = arith.constant 5.000000e-01 : f32
    %8 = vector.broadcast %cst_1 : f32 to vector<8x128xf32>
    %9 = arith.mulf %8, %7 : vector<8x128xf32>
    %10 = arith.select %5, %7, %9 : vector<8x128xi1>, vector<8x128xf32>
    %11 = math.tanh %10 : vector<8x128xf32>
    %cst_2 = arith.constant 5.000000e-01 : f32
    %12 = vector.broadcast %cst_2 : f32 to vector<8x128xf32>
    %13 = arith.mulf %12, %11 : vector<8x128xf32>
    %cst_3 = arith.constant 5.000000e-01 : f32
    %14 = vector.broadcast %cst_3 : f32 to vector<8x128xf32>
    %15 = arith.addf %13, %14 : vector<8x128xf32>
    %16 = arith.select %5, %11, %15 : vector<8x128xi1>, vector<8x128xf32>
    %c96_i32_4 = arith.constant 96 : i32
    %17 = tpu.dynamic_rotate %16 by %c96_i32_4 dim 1 : vector<8x128xf32>, i32 -> vector<8x128xf32>
    %c64_i32_5 = arith.constant 64 : i32
    %18 = tpu.dynamic_rotate %16 by %c64_i32_5 dim 1 : vector<8x128xf32>, i32 -> vector<8x128xf32>
    %c32_i32 = arith.constant 32 : i32
    %19 = tpu.dynamic_rotate %16 by %c32_i32 dim 1 : vector<8x128xf32>, i32 -> vector<8x128xf32>
    %20 = arith.mulf %17, %6 : vector<8x128xf32>
    %21 = arith.mulf %16, %18 : vector<8x128xf32>
    %22 = arith.addf %20, %21 : vector<8x128xf32>
    %23 = math.tanh %22 : vector<8x128xf32>
    %24 = arith.mulf %19, %23 : vector<8x128xf32>
    %c0_6 = arith.constant 0 : index
    %c0_7 = arith.constant 0 : index
    %25 = vector.load %arg5[%c0_6, %c0_7] : memref<128x128xf32, #tpu.memory_space<vmem>>, vector<128x128xf32>
    %cst_8 = arith.constant dense<0.000000e+00> : vector<8x128xf32>
    %26 = tpu.matmul %24, %25, %cst_8 {dimension_numbers = #tpu.dot_dimension_numbers<[1], [0], [0], [1], [0, 0, 1, 1], [], []>} : vector<8x128xf32>, vector<128x128xf32>, vector<8x128xf32> -> vector<8x128xf32>
    %c0_9 = arith.constant 0 : index
    %c0_10 = arith.constant 0 : index
    %27 = vector.load %arg6[%c0_9, %c0_10] : memref<1x128xf32, #tpu.memory_space<vmem>>, vector<1x128xf32>
    %28 = vector.broadcast %27 : vector<1x128xf32> to vector<8x128xf32>
    %29 = arith.addf %26, %28 : vector<8x128xf32>
    %c0_11 = arith.constant 0 : index
    %c0_12 = arith.constant 0 : index
    %30 = vector.load %arg3[%c0_11, %c0_12] : memref<128x128xf32, #tpu.memory_space<vmem>>, vector<128x128xf32>
    %c0_13 = arith.constant 0 : index
    %c0_14 = arith.constant 0 : index
    %c0_15 = arith.constant 0 : index
    %31 = vector.load %arg1[%c0_13, %c0_14, %c0_15] : memref<8x8x128xf32, #tpu.memory_space<vmem>>, vector<1x8x128xf32>
    %32 = vector.shape_cast %31 : vector<1x8x128xf32> to vector<8x128xf32>
    %cst_16 = arith.constant 5.000000e-01 : f32
    %33 = vector.broadcast %cst_16 : f32 to vector<8x128xf32>
    %34 = arith.mulf %33, %32 : vector<8x128xf32>
    %35 = arith.select %5, %32, %34 : vector<8x128xi1>, vector<8x128xf32>
    %36 = math.tanh %35 : vector<8x128xf32>
    %cst_17 = arith.constant 5.000000e-01 : f32
    %37 = vector.broadcast %cst_17 : f32 to vector<8x128xf32>
    %38 = arith.mulf %37, %36 : vector<8x128xf32>
    %cst_18 = arith.constant 5.000000e-01 : f32
    %39 = vector.broadcast %cst_18 : f32 to vector<8x128xf32>
    %40 = arith.addf %38, %39 : vector<8x128xf32>
    %41 = arith.select %5, %36, %40 : vector<8x128xi1>, vector<8x128xf32>
    %c96_i32_19 = arith.constant 96 : i32
    %42 = tpu.dynamic_rotate %41 by %c96_i32_19 dim 1 : vector<8x128xf32>, i32 -> vector<8x128xf32>
    %c64_i32_20 = arith.constant 64 : i32
    %43 = tpu.dynamic_rotate %41 by %c64_i32_20 dim 1 : vector<8x128xf32>, i32 -> vector<8x128xf32>
    %c32_i32_21 = arith.constant 32 : i32
    %44 = tpu.dynamic_rotate %41 by %c32_i32_21 dim 1 : vector<8x128xf32>, i32 -> vector<8x128xf32>
    %45 = arith.mulf %42, %6 : vector<8x128xf32>
    %46 = arith.mulf %41, %43 : vector<8x128xf32>
    %47 = arith.addf %45, %46 : vector<8x128xf32>
    %48 = math.tanh %47 : vector<8x128xf32>
    %49 = arith.mulf %44, %48 : vector<8x128xf32>
    %c1 = arith.constant 1 : index
    %c0_22 = arith.constant 0 : index
    %c0_23 = arith.constant 0 : index
    %50 = vector.load %arg1[%c1, %c0_22, %c0_23] : memref<8x8x128xf32, #tpu.memory_space<vmem>>, vector<1x8x128xf32>
    %51 = vector.shape_cast %50 : vector<1x8x128xf32> to vector<8x128xf32>
    %cst_24 = arith.constant dense<0.000000e+00> : vector<8x128xf32>
    %52 = tpu.matmul %49, %30, %cst_24 {dimension_numbers = #tpu.dot_dimension_numbers<[1], [0], [0], [1], [0, 0, 1, 1], [], []>} : vector<8x128xf32>, vector<128x128xf32>, vector<8x128xf32> -> vector<8x128xf32>
    %53 = arith.addf %51, %52 : vector<8x128xf32>
    %cst_25 = arith.constant 5.000000e-01 : f32
    %54 = vector.broadcast %cst_25 : f32 to vector<8x128xf32>
    %55 = arith.mulf %54, %53 : vector<8x128xf32>
    %56 = arith.select %5, %53, %55 : vector<8x128xi1>, vector<8x128xf32>
    %57 = math.tanh %56 : vector<8x128xf32>
    %cst_26 = arith.constant 5.000000e-01 : f32
    %58 = vector.broadcast %cst_26 : f32 to vector<8x128xf32>
    %59 = arith.mulf %58, %57 : vector<8x128xf32>
    %cst_27 = arith.constant 5.000000e-01 : f32
    %60 = vector.broadcast %cst_27 : f32 to vector<8x128xf32>
    %61 = arith.addf %59, %60 : vector<8x128xf32>
    %62 = arith.select %5, %57, %61 : vector<8x128xi1>, vector<8x128xf32>
    %c96_i32_28 = arith.constant 96 : i32
    %63 = tpu.dynamic_rotate %62 by %c96_i32_28 dim 1 : vector<8x128xf32>, i32 -> vector<8x128xf32>
    %c64_i32_29 = arith.constant 64 : i32
    %64 = tpu.dynamic_rotate %62 by %c64_i32_29 dim 1 : vector<8x128xf32>, i32 -> vector<8x128xf32>
    %c32_i32_30 = arith.constant 32 : i32
    %65 = tpu.dynamic_rotate %62 by %c32_i32_30 dim 1 : vector<8x128xf32>, i32 -> vector<8x128xf32>
    %66 = arith.mulf %63, %47 : vector<8x128xf32>
    %67 = arith.mulf %62, %64 : vector<8x128xf32>
    %68 = arith.addf %66, %67 : vector<8x128xf32>
    %69 = math.tanh %68 : vector<8x128xf32>
    %70 = arith.mulf %65, %69 : vector<8x128xf32>
    %c2 = arith.constant 2 : index
    %c0_31 = arith.constant 0 : index
    %c0_32 = arith.constant 0 : index
    %71 = vector.load %arg1[%c2, %c0_31, %c0_32] : memref<8x8x128xf32, #tpu.memory_space<vmem>>, vector<1x8x128xf32>
    %72 = vector.shape_cast %71 : vector<1x8x128xf32> to vector<8x128xf32>
    %cst_33 = arith.constant dense<0.000000e+00> : vector<8x128xf32>
    %73 = tpu.matmul %70, %30, %cst_33 {dimension_numbers = #tpu.dot_dimension_numbers<[1], [0], [0], [1], [0, 0, 1, 1], [], []>} : vector<8x128xf32>, vector<128x128xf32>, vector<8x128xf32> -> vector<8x128xf32>
    %74 = arith.addf %72, %73 : vector<8x128xf32>
    %cst_34 = arith.constant 5.000000e-01 : f32
    %75 = vector.broadcast %cst_34 : f32 to vector<8x128xf32>
    %76 = arith.mulf %75, %74 : vector<8x128xf32>
    %77 = arith.select %5, %74, %76 : vector<8x128xi1>, vector<8x128xf32>
    %78 = math.tanh %77 : vector<8x128xf32>
    %cst_35 = arith.constant 5.000000e-01 : f32
    %79 = vector.broadcast %cst_35 : f32 to vector<8x128xf32>
    %80 = arith.mulf %79, %78 : vector<8x128xf32>
    %cst_36 = arith.constant 5.000000e-01 : f32
    %81 = vector.broadcast %cst_36 : f32 to vector<8x128xf32>
    %82 = arith.addf %80, %81 : vector<8x128xf32>
    %83 = arith.select %5, %78, %82 : vector<8x128xi1>, vector<8x128xf32>
    %c96_i32_37 = arith.constant 96 : i32
    %84 = tpu.dynamic_rotate %83 by %c96_i32_37 dim 1 : vector<8x128xf32>, i32 -> vector<8x128xf32>
    %c64_i32_38 = arith.constant 64 : i32
    %85 = tpu.dynamic_rotate %83 by %c64_i32_38 dim 1 : vector<8x128xf32>, i32 -> vector<8x128xf32>
    %c32_i32_39 = arith.constant 32 : i32
    %86 = tpu.dynamic_rotate %83 by %c32_i32_39 dim 1 : vector<8x128xf32>, i32 -> vector<8x128xf32>
    %87 = arith.mulf %84, %68 : vector<8x128xf32>
    %88 = arith.mulf %83, %85 : vector<8x128xf32>
    %89 = arith.addf %87, %88 : vector<8x128xf32>
    %90 = math.tanh %89 : vector<8x128xf32>
    %91 = arith.mulf %86, %90 : vector<8x128xf32>
    %c3 = arith.constant 3 : index
    %c0_40 = arith.constant 0 : index
    %c0_41 = arith.constant 0 : index
    %92 = vector.load %arg1[%c3, %c0_40, %c0_41] : memref<8x8x128xf32, #tpu.memory_space<vmem>>, vector<1x8x128xf32>
    %93 = vector.shape_cast %92 : vector<1x8x128xf32> to vector<8x128xf32>
    %cst_42 = arith.constant dense<0.000000e+00> : vector<8x128xf32>
    %94 = tpu.matmul %91, %30, %cst_42 {dimension_numbers = #tpu.dot_dimension_numbers<[1], [0], [0], [1], [0, 0, 1, 1], [], []>} : vector<8x128xf32>, vector<128x128xf32>, vector<8x128xf32> -> vector<8x128xf32>
    %95 = arith.addf %93, %94 : vector<8x128xf32>
    %cst_43 = arith.constant 5.000000e-01 : f32
    %96 = vector.broadcast %cst_43 : f32 to vector<8x128xf32>
    %97 = arith.mulf %96, %95 : vector<8x128xf32>
    %98 = arith.select %5, %95, %97 : vector<8x128xi1>, vector<8x128xf32>
    %99 = math.tanh %98 : vector<8x128xf32>
    %cst_44 = arith.constant 5.000000e-01 : f32
    %100 = vector.broadcast %cst_44 : f32 to vector<8x128xf32>
    %101 = arith.mulf %100, %99 : vector<8x128xf32>
    %cst_45 = arith.constant 5.000000e-01 : f32
    %102 = vector.broadcast %cst_45 : f32 to vector<8x128xf32>
    %103 = arith.addf %101, %102 : vector<8x128xf32>
    %104 = arith.select %5, %99, %103 : vector<8x128xi1>, vector<8x128xf32>
    %c96_i32_46 = arith.constant 96 : i32
    %105 = tpu.dynamic_rotate %104 by %c96_i32_46 dim 1 : vector<8x128xf32>, i32 -> vector<8x128xf32>
    %c64_i32_47 = arith.constant 64 : i32
    %106 = tpu.dynamic_rotate %104 by %c64_i32_47 dim 1 : vector<8x128xf32>, i32 -> vector<8x128xf32>
    %c32_i32_48 = arith.constant 32 : i32
    %107 = tpu.dynamic_rotate %104 by %c32_i32_48 dim 1 : vector<8x128xf32>, i32 -> vector<8x128xf32>
    %108 = arith.mulf %105, %89 : vector<8x128xf32>
    %109 = arith.mulf %104, %106 : vector<8x128xf32>
    %110 = arith.addf %108, %109 : vector<8x128xf32>
    %111 = math.tanh %110 : vector<8x128xf32>
    %112 = arith.mulf %107, %111 : vector<8x128xf32>
    %c4 = arith.constant 4 : index
    %c0_49 = arith.constant 0 : index
    %c0_50 = arith.constant 0 : index
    %113 = vector.load %arg1[%c4, %c0_49, %c0_50] : memref<8x8x128xf32, #tpu.memory_space<vmem>>, vector<1x8x128xf32>
    %114 = vector.shape_cast %113 : vector<1x8x128xf32> to vector<8x128xf32>
    %cst_51 = arith.constant dense<0.000000e+00> : vector<8x128xf32>
    %115 = tpu.matmul %112, %30, %cst_51 {dimension_numbers = #tpu.dot_dimension_numbers<[1], [0], [0], [1], [0, 0, 1, 1], [], []>} : vector<8x128xf32>, vector<128x128xf32>, vector<8x128xf32> -> vector<8x128xf32>
    %116 = arith.addf %114, %115 : vector<8x128xf32>
    %cst_52 = arith.constant 5.000000e-01 : f32
    %117 = vector.broadcast %cst_52 : f32 to vector<8x128xf32>
    %118 = arith.mulf %117, %116 : vector<8x128xf32>
    %119 = arith.select %5, %116, %118 : vector<8x128xi1>, vector<8x128xf32>
    %120 = math.tanh %119 : vector<8x128xf32>
    %cst_53 = arith.constant 5.000000e-01 : f32
    %121 = vector.broadcast %cst_53 : f32 to vector<8x128xf32>
    %122 = arith.mulf %121, %120 : vector<8x128xf32>
    %cst_54 = arith.constant 5.000000e-01 : f32
    %123 = vector.broadcast %cst_54 : f32 to vector<8x128xf32>
    %124 = arith.addf %122, %123 : vector<8x128xf32>
    %125 = arith.select %5, %120, %124 : vector<8x128xi1>, vector<8x128xf32>
    %c96_i32_55 = arith.constant 96 : i32
    %126 = tpu.dynamic_rotate %125 by %c96_i32_55 dim 1 : vector<8x128xf32>, i32 -> vector<8x128xf32>
    %c64_i32_56 = arith.constant 64 : i32
    %127 = tpu.dynamic_rotate %125 by %c64_i32_56 dim 1 : vector<8x128xf32>, i32 -> vector<8x128xf32>
    %c32_i32_57 = arith.constant 32 : i32
    %128 = tpu.dynamic_rotate %125 by %c32_i32_57 dim 1 : vector<8x128xf32>, i32 -> vector<8x128xf32>
    %129 = arith.mulf %126, %110 : vector<8x128xf32>
    %130 = arith.mulf %125, %127 : vector<8x128xf32>
    %131 = arith.addf %129, %130 : vector<8x128xf32>
    %132 = math.tanh %131 : vector<8x128xf32>
    %133 = arith.mulf %128, %132 : vector<8x128xf32>
    %c5 = arith.constant 5 : index
    %c0_58 = arith.constant 0 : index
    %c0_59 = arith.constant 0 : index
    %134 = vector.load %arg1[%c5, %c0_58, %c0_59] : memref<8x8x128xf32, #tpu.memory_space<vmem>>, vector<1x8x128xf32>
    %135 = vector.shape_cast %134 : vector<1x8x128xf32> to vector<8x128xf32>
    %cst_60 = arith.constant dense<0.000000e+00> : vector<8x128xf32>
    %136 = tpu.matmul %133, %30, %cst_60 {dimension_numbers = #tpu.dot_dimension_numbers<[1], [0], [0], [1], [0, 0, 1, 1], [], []>} : vector<8x128xf32>, vector<128x128xf32>, vector<8x128xf32> -> vector<8x128xf32>
    %137 = arith.addf %135, %136 : vector<8x128xf32>
    %cst_61 = arith.constant 5.000000e-01 : f32
    %138 = vector.broadcast %cst_61 : f32 to vector<8x128xf32>
    %139 = arith.mulf %138, %137 : vector<8x128xf32>
    %140 = arith.select %5, %137, %139 : vector<8x128xi1>, vector<8x128xf32>
    %141 = math.tanh %140 : vector<8x128xf32>
    %cst_62 = arith.constant 5.000000e-01 : f32
    %142 = vector.broadcast %cst_62 : f32 to vector<8x128xf32>
    %143 = arith.mulf %142, %141 : vector<8x128xf32>
    %cst_63 = arith.constant 5.000000e-01 : f32
    %144 = vector.broadcast %cst_63 : f32 to vector<8x128xf32>
    %145 = arith.addf %143, %144 : vector<8x128xf32>
    %146 = arith.select %5, %141, %145 : vector<8x128xi1>, vector<8x128xf32>
    %c96_i32_64 = arith.constant 96 : i32
    %147 = tpu.dynamic_rotate %146 by %c96_i32_64 dim 1 : vector<8x128xf32>, i32 -> vector<8x128xf32>
    %c64_i32_65 = arith.constant 64 : i32
    %148 = tpu.dynamic_rotate %146 by %c64_i32_65 dim 1 : vector<8x128xf32>, i32 -> vector<8x128xf32>
    %c32_i32_66 = arith.constant 32 : i32
    %149 = tpu.dynamic_rotate %146 by %c32_i32_66 dim 1 : vector<8x128xf32>, i32 -> vector<8x128xf32>
    %150 = arith.mulf %147, %131 : vector<8x128xf32>
    %151 = arith.mulf %146, %148 : vector<8x128xf32>
    %152 = arith.addf %150, %151 : vector<8x128xf32>
    %153 = math.tanh %152 : vector<8x128xf32>
    %154 = arith.mulf %149, %153 : vector<8x128xf32>
    %c6 = arith.constant 6 : index
    %c0_67 = arith.constant 0 : index
    %c0_68 = arith.constant 0 : index
    %155 = vector.load %arg1[%c6, %c0_67, %c0_68] : memref<8x8x128xf32, #tpu.memory_space<vmem>>, vector<1x8x128xf32>
    %156 = vector.shape_cast %155 : vector<1x8x128xf32> to vector<8x128xf32>
    %cst_69 = arith.constant dense<0.000000e+00> : vector<8x128xf32>
    %157 = tpu.matmul %154, %30, %cst_69 {dimension_numbers = #tpu.dot_dimension_numbers<[1], [0], [0], [1], [0, 0, 1, 1], [], []>} : vector<8x128xf32>, vector<128x128xf32>, vector<8x128xf32> -> vector<8x128xf32>
    %158 = arith.addf %156, %157 : vector<8x128xf32>
    %cst_70 = arith.constant 5.000000e-01 : f32
    %159 = vector.broadcast %cst_70 : f32 to vector<8x128xf32>
    %160 = arith.mulf %159, %158 : vector<8x128xf32>
    %161 = arith.select %5, %158, %160 : vector<8x128xi1>, vector<8x128xf32>
    %162 = math.tanh %161 : vector<8x128xf32>
    %cst_71 = arith.constant 5.000000e-01 : f32
    %163 = vector.broadcast %cst_71 : f32 to vector<8x128xf32>
    %164 = arith.mulf %163, %162 : vector<8x128xf32>
    %cst_72 = arith.constant 5.000000e-01 : f32
    %165 = vector.broadcast %cst_72 : f32 to vector<8x128xf32>
    %166 = arith.addf %164, %165 : vector<8x128xf32>
    %167 = arith.select %5, %162, %166 : vector<8x128xi1>, vector<8x128xf32>
    %c96_i32_73 = arith.constant 96 : i32
    %168 = tpu.dynamic_rotate %167 by %c96_i32_73 dim 1 : vector<8x128xf32>, i32 -> vector<8x128xf32>
    %c64_i32_74 = arith.constant 64 : i32
    %169 = tpu.dynamic_rotate %167 by %c64_i32_74 dim 1 : vector<8x128xf32>, i32 -> vector<8x128xf32>
    %c32_i32_75 = arith.constant 32 : i32
    %170 = tpu.dynamic_rotate %167 by %c32_i32_75 dim 1 : vector<8x128xf32>, i32 -> vector<8x128xf32>
    %171 = arith.mulf %168, %152 : vector<8x128xf32>
    %172 = arith.mulf %167, %169 : vector<8x128xf32>
    %173 = arith.addf %171, %172 : vector<8x128xf32>
    %174 = math.tanh %173 : vector<8x128xf32>
    %175 = arith.mulf %170, %174 : vector<8x128xf32>
    %c7 = arith.constant 7 : index
    %c0_76 = arith.constant 0 : index
    %c0_77 = arith.constant 0 : index
    %176 = vector.load %arg1[%c7, %c0_76, %c0_77] : memref<8x8x128xf32, #tpu.memory_space<vmem>>, vector<1x8x128xf32>
    %177 = vector.shape_cast %176 : vector<1x8x128xf32> to vector<8x128xf32>
    %cst_78 = arith.constant dense<0.000000e+00> : vector<8x128xf32>
    %178 = tpu.matmul %175, %30, %cst_78 {dimension_numbers = #tpu.dot_dimension_numbers<[1], [0], [0], [1], [0, 0, 1, 1], [], []>} : vector<8x128xf32>, vector<128x128xf32>, vector<8x128xf32> -> vector<8x128xf32>
    %179 = arith.addf %177, %178 : vector<8x128xf32>
    %cst_79 = arith.constant 5.000000e-01 : f32
    %180 = vector.broadcast %cst_79 : f32 to vector<8x128xf32>
    %181 = arith.mulf %180, %179 : vector<8x128xf32>
    %182 = arith.select %5, %179, %181 : vector<8x128xi1>, vector<8x128xf32>
    %183 = math.tanh %182 : vector<8x128xf32>
    %cst_80 = arith.constant 5.000000e-01 : f32
    %184 = vector.broadcast %cst_80 : f32 to vector<8x128xf32>
    %185 = arith.mulf %184, %183 : vector<8x128xf32>
    %cst_81 = arith.constant 5.000000e-01 : f32
    %186 = vector.broadcast %cst_81 : f32 to vector<8x128xf32>
    %187 = arith.addf %185, %186 : vector<8x128xf32>
    %188 = arith.select %5, %183, %187 : vector<8x128xi1>, vector<8x128xf32>
    %c96_i32_82 = arith.constant 96 : i32
    %189 = tpu.dynamic_rotate %188 by %c96_i32_82 dim 1 : vector<8x128xf32>, i32 -> vector<8x128xf32>
    %c64_i32_83 = arith.constant 64 : i32
    %190 = tpu.dynamic_rotate %188 by %c64_i32_83 dim 1 : vector<8x128xf32>, i32 -> vector<8x128xf32>
    %c32_i32_84 = arith.constant 32 : i32
    %191 = tpu.dynamic_rotate %188 by %c32_i32_84 dim 1 : vector<8x128xf32>, i32 -> vector<8x128xf32>
    %192 = arith.mulf %189, %173 : vector<8x128xf32>
    %193 = arith.mulf %188, %190 : vector<8x128xf32>
    %194 = arith.addf %192, %193 : vector<8x128xf32>
    %195 = math.tanh %194 : vector<8x128xf32>
    %196 = arith.mulf %191, %195 : vector<8x128xf32>
    %c0_85 = arith.constant 0 : index
    %c0_86 = arith.constant 0 : index
    %197 = vector.load %arg4[%c0_85, %c0_86] : memref<128x128xf32, #tpu.memory_space<vmem>>, vector<128x128xf32>
    %cst_87 = arith.constant dense<0.000000e+00> : vector<8x128xf32>
    %198 = tpu.matmul %196, %197, %cst_87 {dimension_numbers = #tpu.dot_dimension_numbers<[1], [0], [0], [1], [0, 0, 1, 1], [], []>} : vector<8x128xf32>, vector<128x128xf32>, vector<8x128xf32> -> vector<8x128xf32>
    %199 = arith.addf %29, %198 : vector<8x128xf32>
    %cst_88 = arith.constant dense<0xFF800000> : vector<8xf32>
    %200 = vector.multi_reduction <maximumf>, %199, %cst_88 [1] : vector<8x128xf32> to vector<8xf32>
    %201 = vector.shape_cast %200 : vector<8xf32> to vector<8x1xf32>
    %202 = vector.broadcast %201 : vector<8x1xf32> to vector<8x128xf32>
    %203 = arith.subf %199, %202 : vector<8x128xf32>
    %204 = math.exp %203 : vector<8x128xf32>
    %cst_89 = arith.constant dense<0.000000e+00> : vector<8xf32>
    %205 = vector.multi_reduction <add>, %204, %cst_89 [1] : vector<8x128xf32> to vector<8xf32>
    %206 = vector.shape_cast %205 : vector<8xf32> to vector<8x1xf32>
    %207 = vector.broadcast %206 : vector<8x1xf32> to vector<8x128xf32>
    %208 = arith.divf %204, %207 : vector<8x128xf32>
    %c0_90 = arith.constant 0 : index
    %c0_91 = arith.constant 0 : index
    %209 = vector.load %arg7[%c0_90, %c0_91] : memref<8x128xf32, #tpu.memory_space<vmem>>, vector<8x128xf32>
    tpu.vector_store %arg7[%c0_90, %c0_91], %208 {strides = array<i32>} : memref<8x128xf32, #tpu.memory_space<vmem>>, vector<8x128xf32>,
    return
  }
  func.func @transform_0(%arg0: i32) -> (i32, i32, i32) {
    %c0_i32 = arith.constant 0 : i32
    %c0_i32_0 = arith.constant 0 : i32
    %c0_i32_1 = arith.constant 0 : i32
    return %c0_i32, %arg0, %c0_i32_0 : i32, i32, i32
  }
  func.func @transform_1(%arg0: i32) -> (i32, i32) {
    %c0_i32 = arith.constant 0 : i32
    %c0_i32_0 = arith.constant 0 : i32
    return %arg0, %c0_i32 : i32, i32
  }
  func.func @transform_2(%arg0: i32) -> (i32, i32) {
    %c0_i32 = arith.constant 0 : i32
    %c0_i32_0 = arith.constant 0 : i32
    %c0_i32_1 = arith.constant 0 : i32
    return %c0_i32, %c0_i32_0 : i32, i32
  }
  func.func @transform_3(%arg0: i32) -> (i32, i32) {
    %c0_i32 = arith.constant 0 : i32
    %c0_i32_0 = arith.constant 0 : i32
    %c0_i32_1 = arith.constant 0 : i32
    return %c0_i32, %c0_i32_0 : i32, i32
  }
  func.func @transform_4(%arg0: i32) -> (i32, i32) {
    %c0_i32 = arith.constant 0 : i32
    %c0_i32_0 = arith.constant 0 : i32
    %c0_i32_1 = arith.constant 0 : i32
    return %c0_i32, %c0_i32_0 : i32, i32
  }
  func.func @transform_5(%arg0: i32) -> (i32, i32) {
    %c0_i32 = arith.constant 0 : i32
    %c0_i32_0 = arith.constant 0 : i32
    %c0_i32_1 = arith.constant 0 : i32
    return %c0_i32, %c0_i32_0 : i32, i32
  }
  func.func @transform_6(%arg0: i32) -> (i32, i32) {
    %c0_i32 = arith.constant 0 : i32
    %c0_i32_0 = arith.constant 0 : i32
    return %arg0, %c0_i32 : i32, i32
  }
}

</mosaic_0001>

<bundles_post_ra>
// kernel: author_lstm_forward.1
= control target key start
LH: loop header
LB: loop body
LE: loop exit
PB: predicated region body
PF: predicated region fallthrough
CT: control target
= control target key end

     0   :  { %11 = vsyncpa [#allocation3], 0  ;;  %s1465_s21 = smov [#allocation2]   ;;  %s2024_s0 = inlined_call_operand.vmem [shape: f32[8,8,128], index: 0, kind: input, shape index: {}]   ;;  %s2025_s1 = inlined_call_operand.vmem [shape: f32[8,128], index: 1, kind: input, shape index: {}]   ;;  %s2026_s2 = inlined_call_operand.vmem [shape: f32[128,128], index: 2, kind: input, shape index: {}]   ;;  %s2027_s3 = inlined_call_operand.vmem [shape: f32[128,128], index: 3, kind: input, shape index: {}]   ;;  %s2028_s4 = inlined_call_operand.hbm [shape: f32[128,128], index: 4, kind: input, shape index: {}]   ;;  %s2029_s5 = inlined_call_operand.vmem [shape: f32[1,128], index: 5, kind: input, shape index: {}]   ;;  %s2030_s6 = inlined_call_operand.vmem [shape: f32[8,128], index: 6, kind: output, shape index: {}]  }
   0x1   :  { %s25_s22 = sshll.u32 %s1465_s21, 4  ;;  %s26_s22 = int_to_ptr.vmem [resolvable:$true] %s25_s22 }
   0x2   :  { %s1451_s23 = scalar_lea.vmem %s26_s22, 2048  ;;  %p1456_p1 = scmp.lt.s32.totalorder %s26_s22, %s26_s22 }
   0x3   :  { %p1452_p0 = scmp.ne.s32.totalorder %s26_s22, %s1451_s23  ;;  %p1457_p2 = scmp.lt.s32.totalorder %s1451_s23, %s1451_s23 }
   0x5   :  { %p1458_p3 = por %p1457_p2, %p1456_p1 }
   0x7   :  { %p1459_p4 = pnand %p1458_p3, %p1452_p0 }
   0x9   :  { %1462 = shalt.err (!%p1459_p4)
}
   0xa   :  { %s1466_s24 = smov 128   ;;  %s1467_s25 = smov 8  }
   0xb   :  { %31 = dma.hbm_to_vmem [thread:$0]  %s2028_s4, 2048, %s26_s22, [#allocation3], %s1466_s24, %s1466_s24, %s1467_s25  }
   0xc   :  { %1463 = dma.done.wait [#allocation3], 2048  }
   0xd   :  { %1464 = vsyncadd [#allocation3], 4294965248  ;;  %v37_v0 = vlaneseq  ;;  %v1468_v1 = vmov 0.0   ;;  %v169_v4 = vld [vmem:[%s2024_s0] sm:$0xff]  ;;  %v1523_v5 = vld [vmem:[%s2026_s2 + $0x78] sm:$0xff]  ;;  %s1469_s27 = smov 96  }
   0xe   :  { %1115 = vmatprep.subr.mxu1 %v1468_v1  ;;  %1080 = vmatprep.subr.mxu0 %v1468_v1  ;;  %v1528_v6 = vld [vmem:[%s2026_s2 + $0x70] sm:$0xff]  ;;  %v170_v7 = vmul.f32 0.5, %v169_v4  ;;  %v1535_v8 = vld [vmem:[%s2026_s2 + $0x68] sm:$0xff]  ;;  %v1546_v10 = vld [vmem:[%s2026_s2 + $0x60] sm:$0xff]  ;;  %s1470_s28 = smov 32   ;;  %s1471_s8 = smov 64  }
   0xf   :  { %v38_v2 = vand.u32 127, %v37_v0  ;;  %1116 = vmatpush3.msra.mxu1 %v1523_v5  ;;  %v1553_v11 = vld [vmem:[%s2026_s2 + $0x58] sm:$0xff]  ;;  %v1560_v12 = vld [vmem:[%s2026_s2 + $0x50] sm:$0xff]  ;;  %v1567_v13 = vld [vmem:[%s2026_s2 + $0x48] sm:$0xff]  ;;  %vm1472_vm3 = vmmov 0  }
  0x10   :  { %1117 = vmatprep.subr.mxu1 %v1468_v1  ;;  %v1574_v14 = vld [vmem:[%s2026_s2 + $0x40] sm:$0xff]  ;;  %v1581_v17 = vld [vmem:[%s2026_s2 + $0x38] sm:$0xff]  ;;  %v1586_v18 = vld [vmem:[%s2026_s2 + $0x30] sm:$0xff]  ;;  %1147 = vmatprep.mubr.msk.f32.mxu1 %vm1472_vm3, %v1468_v1 }
  0x11   :  { %vm39_vm0 = vcmp.ge.s32.totalorder %v38_v2, 64  ;;  %vm40_vm1 = vcmp.lt.s32.totalorder %v38_v2, 96  ;;  %1118 = vmatpush3.msra.mxu1 %v1528_v6  ;;  %v1594_v20 = vld [vmem:[%s2026_s2 + $0x28] sm:$0xff]  ;;  %v1604_v22 = vld [vmem:[%s2026_s2 + $0x20] sm:$0xff]  ;;  %v1611_v23 = vld [vmem:[%s2026_s2 + $0x18] sm:$0xff]  ;;  %1112 = vmatprep.mubr.msk.f32.mxu0 %vm1472_vm3, %v1468_v1 }
  0x12   :  { %vm1513_vm2 = vmand %vm39_vm0, %vm40_vm1  ;;  %1119 = vmatprep.subr.mxu1 %v1468_v1  ;;  %v1619_v24 = vld [vmem:[%s2026_s2 + $0x10] sm:$0xff]  ;;  %v1627_v25 = vld [vmem:[%s2026_s2 + $0x8] sm:$0xff] }
  0x13   :  { %v171_v9 = vsel %vm1513_vm2, %v169_v4, %v170_v7  ;;  %1120 = vmatpush3.msra.mxu1 %v1535_v8  ;;  %v1634_v26 = vld [vmem:[%s2026_s2] sm:$0xff]  ;;  %v75_v42 = vld [vmem:[#allocation2 + $0x78] sm:$0xff]  ;;  %v74_v43 = vld [vmem:[#allocation2 + $0x70] sm:$0xff] }
  0x14   :  { %1403 = vtanh.f32 %v171_v9  ;;  %1121 = vmatprep.subr.mxu1 %v1468_v1  ;;  %v42_v27 = vld [vmem:[%s2025_s1] sm:$0xff]  ;;  %1081 = vmatpush3.msra.mxu0 %v75_v42  ;;  %v73_v46 = vld [vmem:[#allocation2 + $0x68] sm:$0xff]  ;;  %v71_v50 = vld [vmem:[#allocation2 + $0x58] sm:$0xff] }
  0x15   :  { %1122 = vmatpush3.msra.mxu1 %v1546_v10  ;;  %v43_v28 = vmul.f32 0.5, %v42_v27  ;;  %1082 = vmatprep.subr.mxu0 %v1468_v1  ;;  %v72_v47 = vld [vmem:[#allocation2 + $0x60] sm:$0xff]  ;;  %v70_v51 = vld [vmem:[#allocation2 + $0x50] sm:$0xff]  ;;  %v69_v53 = vld [vmem:[#allocation2 + $0x48] sm:$0xff] }
  0x16   :  { %1123 = vmatprep.subr.mxu1 %v1468_v1  ;;  %1083 = vmatpush3.msra.mxu0 %v74_v43  ;;  %v68_v54 = vld [vmem:[#allocation2 + $0x40] sm:$0xff]  ;;  %v67_v55 = vld [vmem:[#allocation2 + $0x38] sm:$0xff]  ;;  %v66_v56 = vld [vmem:[#allocation2 + $0x30] sm:$0xff] }
  0x17   :  { %1124 = vmatpush3.msra.mxu1 %v1553_v11  ;;  %v44_v29 = vsel %vm1513_vm2, %v42_v27, %v43_v28  ;;  %1084 = vmatprep.subr.mxu0 %v1468_v1  ;;  %v65_v57 = vld [vmem:[#allocation2 + $0x28] sm:$0xff]  ;;  %v64_v58 = vld [vmem:[#allocation2 + $0x20] sm:$0xff]  ;;  %v63_v59 = vld [vmem:[#allocation2 + $0x18] sm:$0xff] }
  0x18   :  { %1125 = vmatprep.subr.mxu1 %v1468_v1  ;;  %1405 = vtanh.f32 %v44_v29  ;;  %1085 = vmatpush3.msra.mxu0 %v73_v46  ;;  %v62_v60 = vld [vmem:[#allocation2 + $0x10] sm:$0xff]  ;;  %v61_v63 = vld [vmem:[#allocation2 + $0x8] sm:$0xff]  ;;  %v60_v2 = vld [vmem:[#allocation2] sm:$0xff] }
  0x19   :  { %1126 = vmatpush3.msra.mxu1 %v1560_v12  ;;  %1086 = vmatprep.subr.mxu0 %v1468_v1  ;;  %v920_v4 = vld [vmem:[%s2024_s0 + $0x8] sm:$0xff] }
  0x1a   :  { %1127 = vmatprep.subr.mxu1 %v1468_v1  ;;  %1087 = vmatpush3.msra.mxu0 %v72_v47  ;;  %v818_v3 = vld [vmem:[%s2027_s3 + $0x8] sm:$0xff] }
  0x1b   :  { %1128 = vmatpush3.msra.mxu1 %v1567_v13  ;;  %1088 = vmatprep.subr.mxu0 %v1468_v1 }
  0x1c   :  { %1129 = vmatprep.subr.mxu1 %v1468_v1  ;;  %1089 = vmatpush3.msra.mxu0 %v71_v50 }
  0x1d   :  { %1130 = vmatpush3.msra.mxu1 %v1574_v14  ;;  %1090 = vmatprep.subr.mxu0 %v1468_v1 }
  0x1e   :  { %1131 = vmatprep.subr.mxu1 %v1468_v1  ;;  %1091 = vmatpush3.msra.mxu0 %v70_v51 }
  0x1f   :  { %1132 = vmatpush3.msra.mxu1 %v1581_v17  ;;  %1092 = vmatprep.subr.mxu0 %v1468_v1 }
  0x20   :  { %1133 = vmatprep.subr.mxu1 %v1468_v1  ;;  %1093 = vmatpush3.msra.mxu0 %v69_v53 }
  0x21   :  { %v1404_v15 = vpop.eup %1403  ;;  %1134 = vmatpush3.msra.mxu1 %v1586_v18  ;;  %1094 = vmatprep.subr.mxu0 %v1468_v1 }
  0x22   :  { %v173_v16 = vmul.f32 0.5, %v1404_v15  ;;  %1135 = vmatprep.subr.mxu1 %v1468_v1  ;;  %1095 = vmatpush3.msra.mxu0 %v68_v54 }
  0x23   :  { %1136 = vmatpush3.msra.mxu1 %v1594_v20  ;;  %1096 = vmatprep.subr.mxu0 %v1468_v1 }
  0x24   :  { %v174_v19 = vadd.f32 0.5, %v173_v16  ;;  %1137 = vmatprep.subr.mxu1 %v1468_v1  ;;  %1097 = vmatpush3.msra.mxu0 %v67_v55 }
  0x25   :  { %1138 = vmatpush3.msra.mxu1 %v1604_v22  ;;  %v1406_v30 = vpop.eup %1405  ;;  %1098 = vmatprep.subr.mxu0 %v1468_v1 }
  0x26   :  { %v175_v21 = vsel %vm1513_vm2, %v1404_v15, %v174_v19  ;;  %1139 = vmatprep.subr.mxu1 %v1468_v1  ;;  %v46_v31 = vmul.f32 0.5, %v1406_v30  ;;  %1099 = vmatpush3.msra.mxu0 %v66_v56 }
  0x27   :  { %176 = vrot.lane.b32.xlu0 %v175_v21, %s1469_s27  ;;  %180 = vrot.lane.b32.xlu1 %v175_v21, %s1470_s28 }
  0x28   :  { %1140 = vmatpush3.msra.mxu1 %v1611_v23  ;;  %v47_v32 = vadd.f32 0.5, %v46_v31  ;;  %1100 = vmatprep.subr.mxu0 %v1468_v1 }
  0x29   :  { %1141 = vmatprep.subr.mxu1 %v1468_v1  ;;  %1101 = vmatpush3.msra.mxu0 %v65_v57 }
  0x2a   :  { %1142 = vmatpush3.msra.mxu1 %v1619_v24  ;;  %v48_v33 = vsel %vm1513_vm2, %v1406_v30, %v47_v32  ;;  %1102 = vmatprep.subr.mxu0 %v1468_v1 }
  0x2b   :  { %178 = vrot.lane.b32.xlu0 %v175_v21, %s1471_s8  ;;  %1143 = vmatprep.subr.mxu1 %v1468_v1 }
  0x2c   :  { %1144 = vmatpush3.msra.mxu1 %v1627_v25  ;;  %49 = vrot.lane.b32.xlu1 %v48_v33, %s1469_s27 }
  0x2d   :  { %1145 = vmatprep.subr.mxu1 %v1468_v1  ;;  %1103 = vmatpush3.msra.mxu0 %v64_v58  ;;  %v922_v58 = vld [vmem:[%s2024_s0 + $0x18] sm:$0xff] }
  0x2e   :  { %1146 = vmatpush3.msra.mxu1 %v1634_v26  ;;  %1104 = vmatprep.subr.mxu0 %v1468_v1 }
  0x2f   :  { %1185 = vmatprep.subr.mxu1 %v1468_v1  ;;  %51 = vrot.lane.b32.xlu0 %v48_v33, %s1471_s8 }
  0x30   :  { %53 = vrot.lane.b32.xlu1 %v48_v33, %s1470_s28  ;;  %1105 = vmatpush3.msra.mxu0 %v63_v59 }
  0x31   :  { %1106 = vmatprep.subr.mxu0 %v1468_v1 }
  0x32   :  { %1107 = vmatpush3.msra.mxu0 %v62_v60 }
  0x33   :  { %1108 = vmatprep.subr.mxu0 %v1468_v1 }
  0x34   :  { %1109 = vmatpush3.msra.mxu0 %v61_v63 }
  0x35   :  { %1110 = vmatprep.subr.mxu0 %v1468_v1 }
  0x36   :  { %1111 = vmatpush3.msra.mxu0 %v60_v2 }
  0x37   :  { %1150 = vmatprep.subr.mxu0 %v1468_v1 }
  0x99   :  { %v177_v34 = vpop.permute.xlu0 %176  ;;  %v181_v39 = vpop.permute.xlu1 %180 }
  0x9a   :  { %v182_v36 = vmul.f32 0.0, %v177_v34 }
  0x9d   :  { %v179_v35 = vpop.permute.xlu0 %178 }
  0x9e   :  { %v183_v37 = vmul.f32 %v179_v35, %v175_v21  ;;  %v50_v45 = vpop.permute.xlu1 %49 }
  0x9f   :  { %v55_v49 = vmul.f32 0.0, %v50_v45 }
  0xa0   :  { %v1653_v38 = vadd.f32 %v183_v37, %v182_v36 }
  0xa1   :  { %v52_v44 = vpop.permute.xlu0 %51 }
  0xa2   :  { %1407 = vtanh.f32 %v1653_v38  ;;  %v56_v48 = vmul.f32 %v52_v44, %v48_v33  ;;  %v54_v62 = vpop.permute.xlu1 %53 }
  0xa4   :  { %v57_v52 = vadd.f32 %v56_v48, %v55_v49 }
  0xa6   :  { %1409 = vtanh.f32 %v57_v52 }
  0xaf   :  { %v1408_v40 = vpop.eup %1407 }
  0xb0   :  { %v186_v41 = vmul.f32 %v1408_v40, %v181_v39 }
  0xb2   :  { %1148 = vmatmul.mubr.f32.vlgmr.msra.gmra.mxu1 %v186_v41 }
  0xb3   :  { %1186 = vmatpush3.msra.mxu1 %v1523_v5  ;;  %1217 = vmatprep.mubr.msk.f32.mxu1 %vm1472_vm3, %v1468_v1  ;;  %v1410_v61 = vpop.eup %1409 }
  0xb4   :  { %1187 = vmatprep.subr.mxu1 %v1468_v1  ;;  %v59_v0 = vmul.f32 %v1410_v61, %v54_v62 }
  0xb5   :  { %1188 = vmatpush3.msra.mxu1 %v1528_v6 }
  0xb6   :  { %1189 = vmatprep.subr.mxu1 %v1468_v1  ;;  %1113 = vmatmul.mubr.f32.vlgmr.msra.gmra.mxu0 %v59_v0 }
  0xb7   :  { %1190 = vmatpush3.msra.mxu1 %v1535_v8  ;;  %1151 = vmatpush3.msra.mxu0 %v1523_v5 }
  0xb8   :  { %1191 = vmatprep.subr.mxu1 %v1468_v1  ;;  %1182 = vmatprep.mubr.msk.f32.mxu0 %vm1472_vm3, %v1468_v1 }
  0xb9   :  { %1192 = vmatpush3.msra.mxu1 %v1546_v10  ;;  %1152 = vmatprep.subr.mxu0 %v1468_v1 }
  0xba   :  { %1193 = vmatprep.subr.mxu1 %v1468_v1  ;;  %1153 = vmatpush3.msra.mxu0 %v1528_v6 }
  0xbb   :  { %1194 = vmatpush3.msra.mxu1 %v1553_v11  ;;  %1154 = vmatprep.subr.mxu0 %v1468_v1 }
  0xbc   :  { %1195 = vmatprep.subr.mxu1 %v1468_v1  ;;  %1155 = vmatpush3.msra.mxu0 %v1535_v8 }
  0xbd   :  { %1196 = vmatpush3.msra.mxu1 %v1560_v12  ;;  %1156 = vmatprep.subr.mxu0 %v1468_v1 }
  0xbe   :  { %1197 = vmatprep.subr.mxu1 %v1468_v1  ;;  %1157 = vmatpush3.msra.mxu0 %v1546_v10 }
  0xbf   :  { %1198 = vmatpush3.msra.mxu1 %v1567_v13  ;;  %1158 = vmatprep.subr.mxu0 %v1468_v1 }
  0xc0   :  { %1199 = vmatprep.subr.mxu1 %v1468_v1  ;;  %1159 = vmatpush3.msra.mxu0 %v1553_v11 }
  0xc1   :  { %1200 = vmatpush3.msra.mxu1 %v1574_v14  ;;  %1160 = vmatprep.subr.mxu0 %v1468_v1 }
  0xc2   :  { %1201 = vmatprep.subr.mxu1 %v1468_v1  ;;  %1161 = vmatpush3.msra.mxu0 %v1560_v12 }
  0xc3   :  { %1202 = vmatpush3.msra.mxu1 %v1581_v17  ;;  %1162 = vmatprep.subr.mxu0 %v1468_v1 }
  0xc4   :  { %1203 = vmatprep.subr.mxu1 %v1468_v1  ;;  %1163 = vmatpush3.msra.mxu0 %v1567_v13 }
  0xc5   :  { %1204 = vmatpush3.msra.mxu1 %v1586_v18  ;;  %1164 = vmatprep.subr.mxu0 %v1468_v1 }
  0xc6   :  { %1205 = vmatprep.subr.mxu1 %v1468_v1  ;;  %1165 = vmatpush3.msra.mxu0 %v1574_v14 }
  0xc7   :  { %1206 = vmatpush3.msra.mxu1 %v1594_v20  ;;  %1166 = vmatprep.subr.mxu0 %v1468_v1 }
  0xc8   :  { %1207 = vmatprep.subr.mxu1 %v1468_v1  ;;  %1167 = vmatpush3.msra.mxu0 %v1581_v17 }
  0xc9   :  { %1208 = vmatpush3.msra.mxu1 %v1604_v22  ;;  %1168 = vmatprep.subr.mxu0 %v1468_v1 }
  0xca   :  { %1209 = vmatprep.subr.mxu1 %v1468_v1  ;;  %1169 = vmatpush3.msra.mxu0 %v1586_v18 }
  0xcb   :  { %1210 = vmatpush3.msra.mxu1 %v1611_v23  ;;  %1170 = vmatprep.subr.mxu0 %v1468_v1 }
  0xcc   :  { %1211 = vmatprep.subr.mxu1 %v1468_v1  ;;  %1171 = vmatpush3.msra.mxu0 %v1594_v20 }
  0xcd   :  { %1212 = vmatpush3.msra.mxu1 %v1619_v24  ;;  %1172 = vmatprep.subr.mxu0 %v1468_v1 }
  0xce   :  { %1213 = vmatprep.subr.mxu1 %v1468_v1  ;;  %1173 = vmatpush3.msra.mxu0 %v1604_v22 }
  0xcf   :  { %1214 = vmatpush3.msra.mxu1 %v1627_v25  ;;  %1174 = vmatprep.subr.mxu0 %v1468_v1 }
  0xd0   :  { %1215 = vmatprep.subr.mxu1 %v1468_v1  ;;  %1175 = vmatpush3.msra.mxu0 %v1611_v23 }
  0xd1   :  { %1216 = vmatpush3.msra.mxu1 %v1634_v26  ;;  %1176 = vmatprep.subr.mxu0 %v1468_v1 }
  0xd2   :  { %1255 = vmatprep.subr.mxu1 %v1468_v1  ;;  %1177 = vmatpush3.msra.mxu0 %v1619_v24 }
  0xd3   :  { %1178 = vmatprep.subr.mxu0 %v1468_v1 }
  0xd4   :  { %1179 = vmatpush3.msra.mxu0 %v1627_v25 }
  0xd5   :  { %1180 = vmatprep.subr.mxu0 %v1468_v1 }
  0xd6   :  { %1181 = vmatpush3.msra.mxu0 %v1634_v26 }
  0xd7   :  { %1220 = vmatprep.subr.mxu0 %v1468_v1 }
 0x172   :  { %v255_v7 = vpop.f32.mrf.mxu1 }
 0x173   :  { %v259_v9 = vadd.f32 %v920_v4, %v255_v7 }
 0x174   :  { %v1149_v15 = vpop.f32.mrf.mxu1 }
 0x175   :  { %v260_v16 = vmul.f32 0.5, %v259_v9 }
 0x176   :  { %v1750_v30 = vpop.f32.mrf.mxu0 }
 0x177   :  { %v261_v19 = vsel %vm1513_vm2, %v259_v9, %v260_v16 }
 0x178   :  { %1411 = vtanh.f32 %v261_v19  ;;  %v1114_v31 = vpop.f32.mrf.mxu0 }
 0x179   :  { %v923_v31 = vld [vmem:[%s2024_s0 + $0x20] sm:$0xff] }
 0x185   :  { %v1412_v21 = vpop.eup %1411 }
 0x186   :  { %v263_v27 = vmul.f32 0.5, %v1412_v21 }
 0x188   :  { %v264_v28 = vadd.f32 0.5, %v263_v27 }
 0x18a   :  { %v265_v29 = vsel %vm1513_vm2, %v1412_v21, %v264_v28 }
 0x18b   :  { %266 = vrot.lane.b32.xlu0 %v265_v29, %s1469_s27  ;;  %268 = vrot.lane.b32.xlu1 %v265_v29, %s1471_s8 }
 0x18f   :  { %270 = vrot.lane.b32.xlu0 %v265_v29, %s1470_s28 }
 0x1fd   :  { %v267_v32 = vpop.permute.xlu0 %266  ;;  %v269_v33 = vpop.permute.xlu1 %268 }
 0x1fe   :  { %v272_v34 = vmul.f32 %v267_v32, %v1653_v38  ;;  %v273_v35 = vmul.f32 %v269_v33, %v265_v29  ;;  %v921_v38 = vld [vmem:[%s2024_s0 + $0x10] sm:$0xff] }
 0x200   :  { %v274_v36 = vadd.f32 %v273_v35, %v272_v34 }
 0x201   :  { %v271_v39 = vpop.permute.xlu0 %270 }
 0x202   :  { %1413 = vtanh.f32 %v274_v36 }
 0x20f   :  { %v1414_v37 = vpop.eup %1413 }
 0x210   :  { %v276_v40 = vmul.f32 %v1414_v37, %v271_v39 }
 0x212   :  { %1183 = vmatmul.mubr.f32.vlgmr.msra.gmra.mxu0 %v276_v40 }
 0x213   :  { %1221 = vmatpush3.msra.mxu0 %v1523_v5  ;;  %1252 = vmatprep.mubr.msk.f32.mxu0 %vm1472_vm3, %v1468_v1 }
 0x214   :  { %1222 = vmatprep.subr.mxu0 %v1468_v1 }
 0x215   :  { %1223 = vmatpush3.msra.mxu0 %v1528_v6 }
 0x216   :  { %1224 = vmatprep.subr.mxu0 %v1468_v1 }
 0x217   :  { %1225 = vmatpush3.msra.mxu0 %v1535_v8 }
 0x218   :  { %1226 = vmatprep.subr.mxu0 %v1468_v1 }
 0x219   :  { %1227 = vmatpush3.msra.mxu0 %v1546_v10 }
 0x21a   :  { %1228 = vmatprep.subr.mxu0 %v1468_v1 }
 0x21b   :  { %1229 = vmatpush3.msra.mxu0 %v1553_v11 }
 0x21c   :  { %1230 = vmatprep.subr.mxu0 %v1468_v1 }
 0x21d   :  { %1231 = vmatpush3.msra.mxu0 %v1560_v12 }
 0x21e   :  { %1232 = vmatprep.subr.mxu0 %v1468_v1 }
 0x21f   :  { %1233 = vmatpush3.msra.mxu0 %v1567_v13 }
 0x220   :  { %1234 = vmatprep.subr.mxu0 %v1468_v1 }
 0x221   :  { %1235 = vmatpush3.msra.mxu0 %v1574_v14 }
 0x222   :  { %1236 = vmatprep.subr.mxu0 %v1468_v1 }
 0x223   :  { %1237 = vmatpush3.msra.mxu0 %v1581_v17 }
 0x224   :  { %1238 = vmatprep.subr.mxu0 %v1468_v1 }
 0x225   :  { %1239 = vmatpush3.msra.mxu0 %v1586_v18 }
 0x226   :  { %1240 = vmatprep.subr.mxu0 %v1468_v1 }
 0x227   :  { %1241 = vmatpush3.msra.mxu0 %v1594_v20 }
 0x228   :  { %1242 = vmatprep.subr.mxu0 %v1468_v1 }
 0x229   :  { %1243 = vmatpush3.msra.mxu0 %v1604_v22 }
 0x22a   :  { %1244 = vmatprep.subr.mxu0 %v1468_v1 }
 0x22b   :  { %1245 = vmatpush3.msra.mxu0 %v1611_v23 }
 0x22c   :  { %1246 = vmatprep.subr.mxu0 %v1468_v1 }
 0x22d   :  { %1247 = vmatpush3.msra.mxu0 %v1619_v24 }
 0x22e   :  { %1248 = vmatprep.subr.mxu0 %v1468_v1 }
 0x22f   :  { %1249 = vmatpush3.msra.mxu0 %v1627_v25 }
 0x230   :  { %1250 = vmatprep.subr.mxu0 %v1468_v1 }
 0x231   :  { %1251 = vmatpush3.msra.mxu0 %v1634_v26 }
 0x232   :  { %1290 = vmatprep.subr.mxu0 %v1468_v1 }
 0x2d2   :  { %v345_v41 = vpop.f32.mrf.mxu0 }
 0x2d3   :  { %v349_v42 = vadd.f32 %v921_v38, %v345_v41 }
 0x2d4   :  { %v1184_v43 = vpop.f32.mrf.mxu0 }
 0x2d5   :  { %v350_v44 = vmul.f32 0.5, %v349_v42 }
 0x2d7   :  { %v351_v45 = vsel %vm1513_vm2, %v349_v42, %v350_v44 }
 0x2d8   :  { %1415 = vtanh.f32 %v351_v45 }
 0x2e5   :  { %v1416_v46 = vpop.eup %1415 }
 0x2e6   :  { %v353_v47 = vmul.f32 0.5, %v1416_v46 }
 0x2e8   :  { %v354_v48 = vadd.f32 0.5, %v353_v47 }
 0x2ea   :  { %v355_v49 = vsel %vm1513_vm2, %v1416_v46, %v354_v48 }
 0x2eb   :  { %358 = vrot.lane.b32.xlu0 %v355_v49, %s1471_s8  ;;  %356 = vrot.lane.b32.xlu1 %v355_v49, %s1469_s27 }
 0x2ef   :  { %360 = vrot.lane.b32.xlu1 %v355_v49, %s1470_s28 }
 0x35d   :  { %v359_v50 = vpop.permute.xlu0 %358  ;;  %v357_v51 = vpop.permute.xlu1 %356 }
 0x35e   :  { %v363_v52 = vmul.f32 %v359_v50, %v355_v49  ;;  %v362_v53 = vmul.f32 %v357_v51, %v274_v36  ;;  %v925_v51 = vld [vmem:[%s2024_s0 + $0x30] sm:$0xff] }
 0x360   :  { %v364_v54 = vadd.f32 %v363_v52, %v362_v53 }
 0x361   :  { %v361_v56 = vpop.permute.xlu1 %360 }
 0x362   :  { %1417 = vtanh.f32 %v364_v54 }
 0x36f   :  { %v1418_v55 = vpop.eup %1417 }
 0x370   :  { %v366_v57 = vmul.f32 %v1418_v55, %v361_v56 }
 0x372   :  { %1218 = vmatmul.mubr.f32.vlgmr.msra.gmra.mxu1 %v366_v57 }
 0x373   :  { %1256 = vmatpush3.msra.mxu1 %v1523_v5  ;;  %1287 = vmatprep.mubr.msk.f32.mxu1 %vm1472_vm3, %v1468_v1 }
 0x374   :  { %1257 = vmatprep.subr.mxu1 %v1468_v1 }
 0x375   :  { %1258 = vmatpush3.msra.mxu1 %v1528_v6 }
 0x376   :  { %1259 = vmatprep.subr.mxu1 %v1468_v1 }
 0x377   :  { %1260 = vmatpush3.msra.mxu1 %v1535_v8 }
 0x378   :  { %1261 = vmatprep.subr.mxu1 %v1468_v1 }
 0x379   :  { %1262 = vmatpush3.msra.mxu1 %v1546_v10 }
 0x37a   :  { %1263 = vmatprep.subr.mxu1 %v1468_v1 }
 0x37b   :  { %1264 = vmatpush3.msra.mxu1 %v1553_v11 }
 0x37c   :  { %1265 = vmatprep.subr.mxu1 %v1468_v1 }
 0x37d   :  { %1266 = vmatpush3.msra.mxu1 %v1560_v12 }
 0x37e   :  { %1267 = vmatprep.subr.mxu1 %v1468_v1 }
 0x37f   :  { %1268 = vmatpush3.msra.mxu1 %v1567_v13 }
 0x380   :  { %1269 = vmatprep.subr.mxu1 %v1468_v1 }
 0x381   :  { %1270 = vmatpush3.msra.mxu1 %v1574_v14 }
 0x382   :  { %1271 = vmatprep.subr.mxu1 %v1468_v1 }
 0x383   :  { %1272 = vmatpush3.msra.mxu1 %v1581_v17 }
 0x384   :  { %1273 = vmatprep.subr.mxu1 %v1468_v1 }
 0x385   :  { %1274 = vmatpush3.msra.mxu1 %v1586_v18 }
 0x386   :  { %1275 = vmatprep.subr.mxu1 %v1468_v1 }
 0x387   :  { %1276 = vmatpush3.msra.mxu1 %v1594_v20 }
 0x388   :  { %1277 = vmatprep.subr.mxu1 %v1468_v1 }
 0x389   :  { %1278 = vmatpush3.msra.mxu1 %v1604_v22 }
 0x38a   :  { %1279 = vmatprep.subr.mxu1 %v1468_v1 }
 0x38b   :  { %1280 = vmatpush3.msra.mxu1 %v1611_v23 }
 0x38c   :  { %1281 = vmatprep.subr.mxu1 %v1468_v1 }
 0x38d   :  { %1282 = vmatpush3.msra.mxu1 %v1619_v24 }
 0x38e   :  { %1283 = vmatprep.subr.mxu1 %v1468_v1 }
 0x38f   :  { %1284 = vmatpush3.msra.mxu1 %v1627_v25 }
 0x390   :  { %1285 = vmatprep.subr.mxu1 %v1468_v1 }
 0x391   :  { %1286 = vmatpush3.msra.mxu1 %v1634_v26 }
 0x392   :  { %1325 = vmatprep.subr.mxu1 %v1468_v1 }
 0x432   :  { %v435_v59 = vpop.f32.mrf.mxu1 }
 0x433   :  { %v439_v60 = vadd.f32 %v922_v58, %v435_v59 }
 0x434   :  { %v1219_v61 = vpop.f32.mrf.mxu1 }
 0x435   :  { %v440_v62 = vmul.f32 0.5, %v439_v60 }
 0x437   :  { %v441_v63 = vsel %vm1513_vm2, %v439_v60, %v440_v62 }
 0x438   :  { %1419 = vtanh.f32 %v441_v63 }
 0x445   :  { %v1420_v0 = vpop.eup %1419 }
 0x446   :  { %v443_v2 = vmul.f32 0.5, %v1420_v0 }
 0x448   :  { %v444_v4 = vadd.f32 0.5, %v443_v2 }
 0x44a   :  { %v445_v7 = vsel %vm1513_vm2, %v1420_v0, %v444_v4 }
 0x44b   :  { %448 = vrot.lane.b32.xlu1 %v445_v7, %s1471_s8  ;;  %446 = vrot.lane.b32.xlu0 %v445_v7, %s1469_s27 }
 0x44f   :  { %450 = vrot.lane.b32.xlu0 %v445_v7, %s1470_s28 }
 0x4bd   :  { %v449_v9 = vpop.permute.xlu1 %448  ;;  %v447_v15 = vpop.permute.xlu0 %446 }
 0x4be   :  { %v453_v16 = vmul.f32 %v449_v9, %v445_v7  ;;  %v452_v19 = vmul.f32 %v447_v15, %v364_v54  ;;  %v832_v15 = vld [vmem:[%s2027_s3 + $0x78] sm:$0xff] }
 0x4c0   :  { %v454_v21 = vadd.f32 %v453_v16, %v452_v19  ;;  %v831_v16 = vld [vmem:[%s2027_s3 + $0x70] sm:$0xff]  ;;  %v830_v19 = vld [vmem:[%s2027_s3 + $0x68] sm:$0xff] }
 0x4c1   :  { %v451_v28 = vpop.permute.xlu0 %450 }
 0x4c2   :  { %1421 = vtanh.f32 %v454_v21 }
 0x4cf   :  { %v1422_v27 = vpop.eup %1421 }
 0x4d0   :  { %v456_v29 = vmul.f32 %v1422_v27, %v451_v28  ;;  %v828_v27 = vld [vmem:[%s2027_s3 + $0x58] sm:$0xff]  ;;  %v827_v28 = vld [vmem:[%s2027_s3 + $0x50] sm:$0xff] }
 0x4d2   :  { %1253 = vmatmul.mubr.f32.vlgmr.msra.gmra.mxu0 %v456_v29  ;;  %v926_v29 = vld [vmem:[%s2024_s0 + $0x38] sm:$0xff] }
 0x4d3   :  { %1291 = vmatpush3.msra.mxu0 %v1523_v5  ;;  %1322 = vmatprep.mubr.msk.f32.mxu0 %vm1472_vm3, %v1468_v1 }
 0x4d4   :  { %1292 = vmatprep.subr.mxu0 %v1468_v1 }
 0x4d5   :  { %1293 = vmatpush3.msra.mxu0 %v1528_v6 }
 0x4d6   :  { %1294 = vmatprep.subr.mxu0 %v1468_v1 }
 0x4d7   :  { %1295 = vmatpush3.msra.mxu0 %v1535_v8 }
 0x4d8   :  { %1296 = vmatprep.subr.mxu0 %v1468_v1 }
 0x4d9   :  { %1297 = vmatpush3.msra.mxu0 %v1546_v10 }
 0x4da   :  { %1298 = vmatprep.subr.mxu0 %v1468_v1 }
 0x4db   :  { %1299 = vmatpush3.msra.mxu0 %v1553_v11 }
 0x4dc   :  { %1300 = vmatprep.subr.mxu0 %v1468_v1 }
 0x4dd   :  { %1301 = vmatpush3.msra.mxu0 %v1560_v12 }
 0x4de   :  { %1302 = vmatprep.subr.mxu0 %v1468_v1 }
 0x4df   :  { %1303 = vmatpush3.msra.mxu0 %v1567_v13 }
 0x4e0   :  { %1304 = vmatprep.subr.mxu0 %v1468_v1 }
 0x4e1   :  { %1305 = vmatpush3.msra.mxu0 %v1574_v14 }
 0x4e2   :  { %1306 = vmatprep.subr.mxu0 %v1468_v1 }
 0x4e3   :  { %1307 = vmatpush3.msra.mxu0 %v1581_v17 }
 0x4e4   :  { %1308 = vmatprep.subr.mxu0 %v1468_v1 }
 0x4e5   :  { %1309 = vmatpush3.msra.mxu0 %v1586_v18 }
 0x4e6   :  { %1310 = vmatprep.subr.mxu0 %v1468_v1 }
 0x4e7   :  { %1311 = vmatpush3.msra.mxu0 %v1594_v20 }
 0x4e8   :  { %1312 = vmatprep.subr.mxu0 %v1468_v1 }
 0x4e9   :  { %1313 = vmatpush3.msra.mxu0 %v1604_v22 }
 0x4ea   :  { %1314 = vmatprep.subr.mxu0 %v1468_v1 }
 0x4eb   :  { %1315 = vmatpush3.msra.mxu0 %v1611_v23 }
 0x4ec   :  { %1316 = vmatprep.subr.mxu0 %v1468_v1 }
 0x4ed   :  { %1317 = vmatpush3.msra.mxu0 %v1619_v24 }
 0x4ee   :  { %1318 = vmatprep.subr.mxu0 %v1468_v1 }
 0x4ef   :  { %1319 = vmatpush3.msra.mxu0 %v1627_v25 }
 0x4f0   :  { %1320 = vmatprep.subr.mxu0 %v1468_v1 }
 0x4f1   :  { %1321 = vmatpush3.msra.mxu0 %v1634_v26 }
 0x4f2   :  { %1360 = vmatprep.subr.mxu0 %v1468_v1 }
 0x592   :  { %v525_v32 = vpop.f32.mrf.mxu0 }
 0x593   :  { %v529_v33 = vadd.f32 %v923_v31, %v525_v32 }
 0x594   :  { %v1254_v34 = vpop.f32.mrf.mxu0 }
 0x595   :  { %v530_v35 = vmul.f32 0.5, %v529_v33 }
 0x597   :  { %v531_v36 = vsel %vm1513_vm2, %v529_v33, %v530_v35 }
 0x598   :  { %1423 = vtanh.f32 %v531_v36  ;;  %v826_v36 = vld [vmem:[%s2027_s3 + $0x48] sm:$0xff] }
 0x5a5   :  { %v1424_v37 = vpop.eup %1423 }
 0x5a6   :  { %v533_v39 = vmul.f32 0.5, %v1424_v37 }
 0x5a8   :  { %v534_v40 = vadd.f32 0.5, %v533_v39  ;;  %v824_v39 = vld [vmem:[%s2027_s3 + $0x38] sm:$0xff] }
 0x5aa   :  { %v535_v38 = vsel %vm1513_vm2, %v1424_v37, %v534_v40  ;;  %v825_v37 = vld [vmem:[%s2027_s3 + $0x40] sm:$0xff]  ;;  %v823_v40 = vld [vmem:[%s2027_s3 + $0x30] sm:$0xff] }
 0x5ab   :  { %538 = vrot.lane.b32.xlu0 %v535_v38, %s1471_s8  ;;  %536 = vrot.lane.b32.xlu1 %v535_v38, %s1469_s27 }
 0x5af   :  { %540 = vrot.lane.b32.xlu1 %v535_v38, %s1470_s28 }
 0x61d   :  { %v539_v41 = vpop.permute.xlu0 %538  ;;  %v537_v42 = vpop.permute.xlu1 %536 }
 0x61e   :  { %v543_v43 = vmul.f32 %v539_v41, %v535_v38  ;;  %v542_v44 = vmul.f32 %v537_v42, %v454_v21  ;;  %v829_v21 = vld [vmem:[%s2027_s3 + $0x60] sm:$0xff]  ;;  %v822_v42 = vld [vmem:[%s2027_s3 + $0x28] sm:$0xff] }
 0x620   :  { %v544_v45 = vadd.f32 %v543_v43, %v542_v44  ;;  %v821_v44 = vld [vmem:[%s2027_s3 + $0x20] sm:$0xff] }
 0x621   :  { %v541_v47 = vpop.permute.xlu1 %540 }
 0x622   :  { %1425 = vtanh.f32 %v544_v45 }
 0x62f   :  { %v1426_v46 = vpop.eup %1425 }
 0x630   :  { %v546_v48 = vmul.f32 %v1426_v46, %v541_v47  ;;  %v820_v46 = vld [vmem:[%s2027_s3 + $0x18] sm:$0xff]  ;;  %v819_v47 = vld [vmem:[%s2027_s3 + $0x10] sm:$0xff] }
 0x632   :  { %1288 = vmatmul.mubr.f32.vlgmr.msra.gmra.mxu1 %v546_v48  ;;  %v817_v48 = vld [vmem:[%s2027_s3] sm:$0xff] }
 0x633   :  { %1326 = vmatpush3.msra.mxu1 %v1523_v5  ;;  %1357 = vmatprep.mubr.msk.f32.mxu1 %vm1472_vm3, %v1468_v1  ;;  %v924_v5 = vld [vmem:[%s2024_s0 + $0x28] sm:$0xff] }
 0x634   :  { %1327 = vmatprep.subr.mxu1 %v1468_v1 }
 0x635   :  { %1328 = vmatpush3.msra.mxu1 %v1528_v6 }
 0x636   :  { %1329 = vmatprep.subr.mxu1 %v1468_v1 }
 0x637   :  { %1330 = vmatpush3.msra.mxu1 %v1535_v8 }
 0x638   :  { %1331 = vmatprep.subr.mxu1 %v1468_v1 }
 0x639   :  { %1332 = vmatpush3.msra.mxu1 %v1546_v10 }
 0x63a   :  { %1333 = vmatprep.subr.mxu1 %v1468_v1 }
 0x63b   :  { %1334 = vmatpush3.msra.mxu1 %v1553_v11 }
 0x63c   :  { %1335 = vmatprep.subr.mxu1 %v1468_v1 }
 0x63d   :  { %1336 = vmatpush3.msra.mxu1 %v1560_v12 }
 0x63e   :  { %1337 = vmatprep.subr.mxu1 %v1468_v1 }
 0x63f   :  { %1338 = vmatpush3.msra.mxu1 %v1567_v13 }
 0x640   :  { %1339 = vmatprep.subr.mxu1 %v1468_v1 }
 0x641   :  { %1340 = vmatpush3.msra.mxu1 %v1574_v14 }
 0x642   :  { %1341 = vmatprep.subr.mxu1 %v1468_v1 }
 0x643   :  { %1342 = vmatpush3.msra.mxu1 %v1581_v17 }
 0x644   :  { %1343 = vmatprep.subr.mxu1 %v1468_v1 }
 0x645   :  { %1344 = vmatpush3.msra.mxu1 %v1586_v18 }
 0x646   :  { %1345 = vmatprep.subr.mxu1 %v1468_v1 }
 0x647   :  { %1346 = vmatpush3.msra.mxu1 %v1594_v20 }
 0x648   :  { %1347 = vmatprep.subr.mxu1 %v1468_v1 }
 0x649   :  { %1348 = vmatpush3.msra.mxu1 %v1604_v22 }
 0x64a   :  { %1349 = vmatprep.subr.mxu1 %v1468_v1 }
 0x64b   :  { %1350 = vmatpush3.msra.mxu1 %v1611_v23 }
 0x64c   :  { %1351 = vmatprep.subr.mxu1 %v1468_v1 }
 0x64d   :  { %1352 = vmatpush3.msra.mxu1 %v1619_v24 }
 0x64e   :  { %1353 = vmatprep.subr.mxu1 %v1468_v1 }
 0x64f   :  { %1354 = vmatpush3.msra.mxu1 %v1627_v25 }
 0x650   :  { %1355 = vmatprep.subr.mxu1 %v1468_v1 }
 0x651   :  { %1356 = vmatpush3.msra.mxu1 %v1634_v26 }
 0x6f2   :  { %v615_v6 = vpop.f32.mrf.mxu1 }
 0x6f3   :  { %v619_v8 = vadd.f32 %v924_v5, %v615_v6 }
 0x6f4   :  { %v1289_v10 = vpop.f32.mrf.mxu1 }
 0x6f5   :  { %v620_v11 = vmul.f32 0.5, %v619_v8 }
 0x6f7   :  { %v621_v12 = vsel %vm1513_vm2, %v619_v8, %v620_v11 }
 0x6f8   :  { %1427 = vtanh.f32 %v621_v12 }
 0x705   :  { %v1428_v13 = vpop.eup %1427 }
 0x706   :  { %v623_v14 = vmul.f32 0.5, %v1428_v13 }
 0x708   :  { %v624_v17 = vadd.f32 0.5, %v623_v14 }
 0x70a   :  { %v625_v18 = vsel %vm1513_vm2, %v1428_v13, %v624_v17  ;;  %v919_v17 = vld [vmem:[%s2029_s5] ss:$0 sm:$0xff] }
 0x70b   :  { %628 = vrot.lane.b32.xlu1 %v625_v18, %s1471_s8  ;;  %626 = vrot.lane.b32.xlu0 %v625_v18, %s1469_s27 }
 0x70f   :  { %630 = vrot.lane.b32.xlu0 %v625_v18, %s1470_s28 }
 0x77d   :  { %v629_v20 = vpop.permute.xlu1 %628  ;;  %v627_v22 = vpop.permute.xlu0 %626 }
 0x77e   :  { %v633_v23 = vmul.f32 %v629_v20, %v625_v18  ;;  %v632_v24 = vmul.f32 %v627_v22, %v544_v45  ;;  %v150_v18 = vadd.f32 %v919_v17, %v1750_v30 }
 0x780   :  { %v634_v25 = vadd.f32 %v633_v23, %v632_v24 }
 0x781   :  { %v631_v49 = vpop.permute.xlu0 %630 }
 0x782   :  { %1429 = vtanh.f32 %v634_v25 }
 0x78f   :  { %v1430_v26 = vpop.eup %1429 }
 0x790   :  { %v636_v50 = vmul.f32 %v1430_v26, %v631_v49 }
 0x792   :  { %1323 = vmatmul.mubr.f32.vlgmr.msra.gmra.mxu0 %v636_v50 }
 0x793   :  { %1392 = vmatprep.mubr.msk.f32.mxu0 %vm1472_vm3, %v1468_v1  ;;  %1361 = vmatpush3.msra.mxu0 %v832_v15 }
 0x794   :  { %1362 = vmatprep.subr.mxu0 %v1468_v1 }
 0x795   :  { %1363 = vmatpush3.msra.mxu0 %v831_v16 }
 0x796   :  { %1364 = vmatprep.subr.mxu0 %v1468_v1 }
 0x797   :  { %1365 = vmatpush3.msra.mxu0 %v830_v19 }
 0x798   :  { %1366 = vmatprep.subr.mxu0 %v1468_v1 }
 0x799   :  { %1367 = vmatpush3.msra.mxu0 %v829_v21 }
 0x79a   :  { %1368 = vmatprep.subr.mxu0 %v1468_v1 }
 0x79b   :  { %1369 = vmatpush3.msra.mxu0 %v828_v27 }
 0x79c   :  { %1370 = vmatprep.subr.mxu0 %v1468_v1 }
 0x79d   :  { %1371 = vmatpush3.msra.mxu0 %v827_v28 }
 0x79e   :  { %1372 = vmatprep.subr.mxu0 %v1468_v1 }
 0x79f   :  { %1373 = vmatpush3.msra.mxu0 %v826_v36 }
 0x7a0   :  { %1374 = vmatprep.subr.mxu0 %v1468_v1 }
 0x7a1   :  { %1375 = vmatpush3.msra.mxu0 %v825_v37 }
 0x7a2   :  { %1376 = vmatprep.subr.mxu0 %v1468_v1 }
 0x7a3   :  { %1377 = vmatpush3.msra.mxu0 %v824_v39 }
 0x7a4   :  { %1378 = vmatprep.subr.mxu0 %v1468_v1 }
 0x7a5   :  { %1379 = vmatpush3.msra.mxu0 %v823_v40 }
 0x7a6   :  { %1380 = vmatprep.subr.mxu0 %v1468_v1 }
 0x7a7   :  { %1381 = vmatpush3.msra.mxu0 %v822_v42 }
 0x7a8   :  { %1382 = vmatprep.subr.mxu0 %v1468_v1 }
 0x7a9   :  { %1383 = vmatpush3.msra.mxu0 %v821_v44 }
 0x7aa   :  { %1384 = vmatprep.subr.mxu0 %v1468_v1 }
 0x7ab   :  { %1385 = vmatpush3.msra.mxu0 %v820_v46 }
 0x7ac   :  { %1386 = vmatprep.subr.mxu0 %v1468_v1 }
 0x7ad   :  { %1387 = vmatpush3.msra.mxu0 %v819_v47 }
 0x7ae   :  { %1388 = vmatprep.subr.mxu0 %v1468_v1 }
 0x7af   :  { %1389 = vmatpush3.msra.mxu0 %v818_v3 }
 0x7b0   :  { %1390 = vmatprep.subr.mxu0 %v1468_v1 }
 0x7b1   :  { %1391 = vmatpush3.msra.mxu0 %v817_v48 }
 0x852   :  { %v705_v52 = vpop.f32.mrf.mxu0 }
 0x853   :  { %v709_v53 = vadd.f32 %v925_v51, %v705_v52 }
 0x854   :  { %v1324_v54 = vpop.f32.mrf.mxu0 }
 0x855   :  { %v710_v55 = vmul.f32 0.5, %v709_v53 }
 0x857   :  { %v711_v56 = vsel %vm1513_vm2, %v709_v53, %v710_v55 }
 0x858   :  { %1431 = vtanh.f32 %v711_v56 }
 0x865   :  { %v1432_v57 = vpop.eup %1431 }
 0x866   :  { %v713_v58 = vmul.f32 0.5, %v1432_v57 }
 0x868   :  { %v714_v59 = vadd.f32 0.5, %v713_v58 }
 0x86a   :  { %v715_v60 = vsel %vm1513_vm2, %v1432_v57, %v714_v59 }
 0x86b   :  { %718 = vrot.lane.b32.xlu0 %v715_v60, %s1471_s8  ;;  %716 = vrot.lane.b32.xlu1 %v715_v60, %s1469_s27 }
 0x86f   :  { %720 = vrot.lane.b32.xlu1 %v715_v60, %s1470_s28 }
 0x8dd   :  { %v719_v61 = vpop.permute.xlu0 %718  ;;  %v717_v62 = vpop.permute.xlu1 %716 }
 0x8de   :  { %v723_v63 = vmul.f32 %v719_v61, %v715_v60  ;;  %v722_v0 = vmul.f32 %v717_v62, %v634_v25 }
 0x8e0   :  { %v1940_v2 = vadd.f32 %v723_v63, %v722_v0 }
 0x8e1   :  { %v721_v7 = vpop.permute.xlu1 %720 }
 0x8e2   :  { %1433 = vtanh.f32 %v1940_v2 }
 0x8ef   :  { %v1434_v4 = vpop.eup %1433 }
 0x8f0   :  { %v726_v9 = vmul.f32 %v1434_v4, %v721_v7 }
 0x8f2   :  { %1358 = vmatmul.mubr.f32.vlgmr.msra.gmra.mxu1 %v726_v9 }
 0x9b2   :  { %v795_v31 = vpop.f32.mrf.mxu1 }
 0x9b3   :  { %v799_v32 = vadd.f32 %v926_v29, %v795_v31 }
 0x9b4   :  { %v1359_v33 = vpop.f32.mrf.mxu1 }
 0x9b5   :  { %v800_v34 = vmul.f32 0.5, %v799_v32 }
 0x9b7   :  { %v801_v35 = vsel %vm1513_vm2, %v799_v32, %v800_v34 }
 0x9b8   :  { %1435 = vtanh.f32 %v801_v35 }
 0x9c5   :  { %v1436_v38 = vpop.eup %1435 }
 0x9c6   :  { %v803_v41 = vmul.f32 0.5, %v1436_v38 }
 0x9c8   :  { %v804_v43 = vadd.f32 0.5, %v803_v41 }
 0x9ca   :  { %v805_v45 = vsel %vm1513_vm2, %v1436_v38, %v804_v43 }
 0x9cb   :  { %808 = vrot.lane.b32.xlu1 %v805_v45, %s1471_s8  ;;  %806 = vrot.lane.b32.xlu0 %v805_v45, %s1469_s27 }
 0x9cf   :  { %810 = vrot.lane.b32.xlu0 %v805_v45, %s1470_s28 }
 0xa3d   :  { %v809_v5 = vpop.permute.xlu1 %808  ;;  %v807_v6 = vpop.permute.xlu0 %806 }
 0xa3e   :  { %v813_v8 = vmul.f32 %v809_v5, %v805_v45  ;;  %v812_v10 = vmul.f32 %v807_v6, %v1940_v2 }
 0xa40   :  { %v814_v11 = vadd.f32 %v813_v8, %v812_v10 }
 0xa41   :  { %v811_v13 = vpop.permute.xlu0 %810 }
 0xa42   :  { %1437 = vtanh.f32 %v814_v11 }
 0xa4f   :  { %v1438_v12 = vpop.eup %1437 }
 0xa50   :  { %v816_v14 = vmul.f32 %v1438_v12, %v811_v13 }
 0xa52   :  { %1393 = vmatmul.mubr.f32.vlgmr.msra.gmra.mxu0 %v816_v14 }
 0xb12   :  { %v899_v20 = vpop.f32.mrf.mxu0 }
 0xb13   :  { %v903_v1 = vadd.f32 %v899_v20, %v150_v18 }
 0xb14   :  { %v1394_v22 = vpop.f32.mrf.mxu0 }
 0xb15   :  { %904 = vmax.xlane.f32.xlu1 %v903_v1 }
 0xb9e   :  { %v905_v23 = vpop.xlane.xlu1 %904 }
 0xb9f   :  { %v906_v24 = vsub.f32 %v903_v1, %v905_v23 }
 0xba1   :  { %v907_v25 = vmul.f32 1.442695, %v906_v24 }
 0xba3   :  { %1439 = vpow2.f32 %v907_v25 }
 0xbb0   :  { %v1440_v26 = vpop.eup %1439 }
 0xbb1   :  { %909 = vadd.xlane.f32.xlu0 %v1440_v26 }
 0xc3a   :  { %v910_v49 = vpop.xlane.xlu0 %909 }
 0xc3b   :  { %1441 = vrcp.f32 %v910_v49 }
 0xc48   :  { %v1442_v50 = vpop.eup %1441 }
 0xc49   :  { %v912_v51 = vmul.f32 %v1442_v50, %v1440_v26 }
 0xc4b   :  { %913 = vst [vmem:[%s2030_s6] sm:$0xff] %v912_v51 }
 0xc4c   :  { %918 = vsyncpa [#allocation3], 1 }

</bundles_post_ra>
